<compile_context>
chip_gen: v7x
topology: tpu7x:2x2x1
jax: 0.10.0
libtpu: 0.0.40
codegen_flags: <defaults>
</compile_context>

<pallas_src>
import math
from functools import partial

import jax
import jax.numpy as jnp
from jax.experimental import pallas as pl
from jax.experimental.pallas import tpu as pltpu


# ---------------------------------------------------------------------------
# helpers
# ---------------------------------------------------------------------------

def _round_up(x, m):
    return -(-x // m) * m


def _sublane(itemsize):
    return 8 if itemsize >= 4 else (16 if itemsize == 2 else 32)


def _vmem_limit_bytes():
    """Generation-aware scoped-VMEM limit (v5e/v6e: 128 MiB physical, v7x: 64 MiB)."""
    cap = 64 * 1024 * 1024  # conservative default = v7x per-TensorCore VMEM
    try:
        info = pltpu.get_tpu_info()
        cap = int(getattr(info, "vmem_capacity_bytes", cap)) or cap
    except Exception:
        pass
    # ~75% of physical: ~96 MiB on v5e/v6e, ~48 MiB on v7x.
    return max(32 * 1024 * 1024, min(cap * 3 // 4, 96 * 1024 * 1024))


def _choose_tb_resident(B, units_in, units_out, x_is, w_is, budget):
    """Batch tile for the weight-resident path."""
    sub = _sublane(x_is)
    if B <= sub:
        return B
    # weight + bias resident (single-buffered); x/out tiles double-buffered by the
    # pipeline; f32 `feat` intermediate and bf16 x-cast temp are compiler scratch
    # but budgeted here so raising the budget stays safe.
    fixed = (units_in * units_out + units_out) * w_is
    per_row = (2 * units_in * x_is                     # x tile (double-buffered)
               + 2 * (units_in + units_out) * x_is     # out tile (double-buffered)
               + units_out * 4                         # f32 feat intermediate
               + (units_in * 2 if w_is < x_is else 0)) # bf16 x cast temp
    avail = budget - fixed
    tb_max = max(sub, avail // per_row) if avail > per_row else sub
    tb = min(tb_max, 1024)
    # Prefer >= 4 grid steps when the batch allows it: keeps the software pipeline
    # busy and gives each of v7x's two TensorCores >= 2 iterations of DMA/compute
    # overlap (the single grid axis is sharded across TCs via "parallel").
    if B >= 4 * sub:
        tb = min(tb, _round_up(-(-B // 4), sub))
    tb = max(sub, (tb // sub) * sub)
    tb = min(tb, (B // sub) * sub)          # never exceed the batch (ragged handled by cdiv grid)
    return max(sub, tb)


def _choose_ntiled_tiles(B, units_in, units_out, x_is, w_is, budget, tn):
    """Batch / column tiles for the units_out-tiled (large-weight) path."""
    sub = _sublane(x_is)
    if tn is None:
        tn = 128
        for cand in (512, 256):
            if units_out % cand == 0 and 2 * (units_in * cand + cand) * w_is <= budget // 3:
                tn = cand
                break
    fixed = 2 * (units_in * tn + tn) * w_is             # weight + bias column tiles
    per_row = (2 * units_in * x_is                      # full x row block
               + 2 * tn * x_is                          # x pass-through column tile
               + 2 * tn * x_is                          # output column tile
               + tn * 4)                                # f32 feat intermediate
    if B <= sub:
        return B, tn
    avail = budget - fixed
    tb_max = max(sub, avail // per_row) if avail > per_row else sub
    tb = max(sub, (min(tb_max, 1024) // sub) * sub)
    tb = max(sub, min(tb, (B // sub) * sub))
    return tb, tn


# ---------------------------------------------------------------------------
# kernels
# ---------------------------------------------------------------------------

def _resident_kernel(x_ref, wt_ref, b_ref, o_ref, *, units_in, units_out):
    # x_ref : [tb, units_in]         wt_ref: [units_in, units_out] (resident)
    # b_ref : [1, units_out]         o_ref : [tb, units_out + units_in]
    x = x_ref[...]
    xm = x if x.dtype == wt_ref.dtype else x.astype(wt_ref.dtype)
    feat = jnp.dot(xm, wt_ref[...], preferred_element_type=jnp.float32)
    feat = jnp.maximum(feat + b_ref[...], 0.0).astype(o_ref.dtype)
    if units_out % 128 == 0:
        # Lane-aligned: two direct unmasked store streams, no lane shuffle.
        o_ref[:, pl.ds(0, units_out)] = feat
        o_ref[:, pl.ds(units_out, units_in)] = x.astype(o_ref.dtype)
    else:
        # Narrow / unaligned widths: build the row in vregs, one lane-dense store.
        o_ref[...] = jnp.concatenate([feat, x.astype(o_ref.dtype)], axis=1)


def _ntiled_kernel(x_ref, xcols_ref, wt_ref, b_ref, o_ref, *, n_feat_tiles):
    # Column-tiled path: grid = (batch tiles, feature tiles + pass-through tiles).
    # x_ref   : [tb, units_in]   xcols_ref: [tb, tn]   wt_ref: [units_in, tn]
    # b_ref   : [1, tn]          o_ref    : [tb, tn]
    j = pl.program_id(1)

    @pl.when(j < n_feat_tiles)
    def _():
        x = x_ref[...]
        xm = x if x.dtype == wt_ref.dtype else x.astype(wt_ref.dtype)
        feat = jnp.dot(xm, wt_ref[...], preferred_element_type=jnp.float32)
        o_ref[...] = jnp.maximum(feat + b_ref[...], 0.0).astype(o_ref.dtype)

    @pl.when(j >= n_feat_tiles)
    def _():
        o_ref[...] = xcols_ref[...]   # identity pass-through columns


# ---------------------------------------------------------------------------
# pallas_call wrappers
# ---------------------------------------------------------------------------

_SINGLE_BUFFER_WEIGHT = {"supported": None}   # probed once at runtime


def _call_resident(x, weight_t, bias2d, tb, vmem_limit, cost):
    B, units_in = x.shape
    units_out = weight_t.shape[1]
    grid = -(-B // tb)                      # cdiv: last partial block is clipped by Pallas
    kernel = partial(_resident_kernel, units_in=units_in, units_out=units_out)
    out_shape = jax.ShapeDtypeStruct((B, units_out + units_in), x.dtype)

    def build(single_buffer):
        if single_buffer:
            # Constant-index weight/bias: no point double-buffering -> halve resident VMEM.
            w_spec = pl.BlockSpec((units_in, units_out), lambda i: (0, 0),
                                  pipeline_mode=pl.Buffered(1))
            b_spec = pl.BlockSpec((1, units_out), lambda i: (0, 0),
                                  pipeline_mode=pl.Buffered(1))
        else:
            w_spec = pl.BlockSpec((units_in, units_out), lambda i: (0, 0))
            b_spec = pl.BlockSpec((1, units_out), lambda i: (0, 0))
        return pl.pallas_call(
            kernel,
            out_shape=out_shape,
            grid_spec=pltpu.PrefetchScalarGridSpec(
                num_scalar_prefetch=0,
                grid=(grid,),
                in_specs=[pl.BlockSpec((tb, units_in), lambda i: (i, 0)),
                          w_spec, b_spec],
                out_specs=pl.BlockSpec((tb, units_out + units_in), lambda i: (i, 0)),
            ),
            compiler_params=pltpu.CompilerParams(
                dimension_semantics=("parallel",),
                vmem_limit_bytes=vmem_limit),
            cost_estimate=cost,
        )

    if _SINGLE_BUFFER_WEIGHT["supported"] is not False:
        try:
            out = build(True)(x, weight_t, bias2d)
            _SINGLE_BUFFER_WEIGHT["supported"] = True
            return out
        except Exception:
            if _SINGLE_BUFFER_WEIGHT["supported"]:
                raise
            _SINGLE_BUFFER_WEIGHT["supported"] = False   # fall back to default buffering
    return build(False)(x, weight_t, bias2d)


def _call_ntiled(x, weight_t, bias2d, tb, tn, vmem_limit, cost):
    B, units_in = x.shape
    units_out = weight_t.shape[1]
    assert tn % 128 == 0 and units_out % tn == 0, "column tile must be lane-aligned"
    n_feat = units_out // tn
    n_pass = -(-units_in // tn)
    grid = (-(-B // tb), n_feat + n_pass)
    kernel = partial(_ntiled_kernel, n_feat_tiles=n_feat)
    out_shape = jax.ShapeDtypeStruct((B, units_out + units_in), x.dtype)

    return pl.pallas_call(
        kernel,
        out_shape=out_shape,
        grid_spec=pltpu.PrefetchScalarGridSpec(
            num_scalar_prefetch=0,
            grid=grid,
            in_specs=[
                # full x rows for the matmul (index constant over j -> fetched once per i)
                pl.BlockSpec((tb, units_in), lambda i, j: (i, 0)),
                # x column tile for the pass-through steps
                pl.BlockSpec((tb, tn), lambda i, j: (i, jnp.maximum(j - n_feat, 0))),
                # weight/bias column tiles (clamped index so pass-through steps
                # re-use the last fetched tile -> no extra weight DMA there)
                pl.BlockSpec((units_in, tn), lambda i, j: (0, jnp.minimum(j, n_feat - 1))),
                pl.BlockSpec((1, tn), lambda i, j: (0, jnp.minimum(j, n_feat - 1))),
            ],
            out_specs=pl.BlockSpec((tb, tn), lambda i, j: (i, j)),
        ),
        compiler_params=pltpu.CompilerParams(
            dimension_semantics=("parallel", "arbitrary"),
            vmem_limit_bytes=vmem_limit),
        cost_estimate=cost,
    )(x, x, weight_t, bias2d)


def densenet_block(x, weight_t, bias2d, *, tb=None, tn=None, bf16_matmul=False):
    """DensenetBlock forward: cat([relu(x @ W^T + b), x], dim=1).

    x        : [B, units_in]
    weight_t : [units_in, units_out]  (pre-transposed ONCE via prepare_params)
    bias2d   : [1, units_out]
    tn       : optional units_out tile -> forces the column-tiled (large-weight) path
    """
    B, units_in = x.shape
    ki, units_out = weight_t.shape
    assert ki == units_in, "weight_t must be pre-transposed to [units_in, units_out]"
    assert bias2d.shape == (1, units_out)
    if bf16_matmul:
        assert weight_t.dtype == jnp.bfloat16, (
            "bf16_matmul=True expects a bf16 weight already in HBM "
            "(prepare_params(..., bf16_weight=True)); only x is cast in-kernel.")
    x_is = jnp.dtype(x.dtype).itemsize
    w_is = jnp.dtype(weight_t.dtype).itemsize

    vmem_limit = _vmem_limit_bytes()
    budget = vmem_limit // 2   # headroom for compiler scratch / pipeline state

    cost = pl.CostEstimate(
        flops=2 * B * units_in * units_out,
        transcendentals=0,
        bytes_accessed=(B * units_in * x_is
                        + (units_in * units_out + units_out) * w_is
                        + B * (units_in + units_out) * x_is),
    )

    # Weight-resident path if the weight fits the budget even with a safety factor;
    # otherwise tile units_out (needed e.g. for v7x's 64 MiB VMEM with big layers).
    resident_fixed = (units_in * units_out + units_out) * w_is
    use_resident = (tn is None) and (2 * resident_fixed <= budget)
    if (not use_resident) and tn is None and (units_out % 128 != 0 or units_in < 128):
        # TODO(synk): column tiling needs lane-aligned units_out and units_in >= 128;
        # fall back to the resident path for these (unrealistic for huge layers).
        use_resident = True

    if use_resident:
        if tb is None:
            tb = _choose_tb_resident(B, units_in, units_out, x_is, w_is, budget)
        return _call_resident(x, weight_t, bias2d, tb, vmem_limit, cost)

    tb_n, tn_n = _choose_ntiled_tiles(B, units_in, units_out, x_is, w_is, budget, tn)
    if tb is not None:
        tb_n = tb
    return _call_ntiled(x, weight_t, bias2d, tb_n, tn_n, vmem_limit, cost)


# ---------------------------------------------------------------------------
# parameter helpers (one-time layout / dtype work, nothing per-call)
# ---------------------------------------------------------------------------

def prepare_params(weight, bias, *, bf16_weight=False):
    """Transpose weight to [units_in, units_out] and reshape bias to 2D once."""
    wt = weight.T
    if bf16_weight:
        wt = wt.astype(jnp.bfloat16)
    return wt, bias.reshape(1, -1)


def init_params(key, units_in, units_out, dtype=jnp.float32):
    """Matches the module: kaiming_uniform_(relu) weight, default nn.Linear bias."""
    kw, kb = jax.random.split(key)
    w_bound = math.sqrt(6.0 / units_in)
    b_bound = 1.0 / math.sqrt(units_in)
    weight = jax.random.uniform(kw, (units_out, units_in), dtype, -w_bound, w_bound)
    bias = jax.random.uniform(kb, (units_out,), dtype, -b_bound, b_bound)
    return weight, bias


# ---------------------------------------------------------------------------
# self-test
# ---------------------------------------------------------------------------

if __name__ == "__main__":
    key = jax.random.PRNGKey(0)
    k_x, k_p, k_x2, k_p2, k_x3 = jax.random.split(key, 5)

    def ref_forward(x, weight, bias):
        return jnp.concatenate([jnp.maximum(x @ weight.T + bias, 0.0), x], axis=1)

    # 1) module-scale shapes (batch=8, units_in=32, units_out=64): 96-lane output
    #    -> single full-width store path; exact f32 check.
    B, ui, uo = 8, 32, 64
    x = jax.random.normal(k_x, (B, ui), jnp.float32)
    weight, bias = init_params(k_p, ui, uo)
    wt, b2 = prepare_params(weight, bias)
    out = jax.block_until_ready(densenet_block(x, wt, b2))
    assert out.shape == (B, uo + ui)
    assert jnp.allclose(out, ref_forward(x, weight, bias), atol=1e-5, rtol=1e-5)

    # 2) ragged batch (B=13, not a multiple of the 8-row tile): verifies the no-pad
    #    cdiv grid clips the last partial block correctly.
    x_r = jax.random.normal(k_x2, (13, ui), jnp.float32)
    out_r = jax.block_until_ready(densenet_block(x_r, wt, b2))
    assert jnp.allclose(out_r, ref_forward(x_r, weight, bias), atol=1e-5, rtol=1e-5)

    # 3) lane-aligned units_out (two-stream unmasked stores) + multi-step grid.
    B3, ui3, uo3 = 32, 128, 256
    x3 = jax.random.normal(k_x3, (B3, ui3), jnp.float32)
    w3, bi3 = init_params(k_p2, ui3, uo3)
    wt3, b3 = prepare_params(w3, bi3)
    out3 = jax.block_until_ready(densenet_block(x3, wt3, b3))
    assert jnp.allclose(out3, ref_forward(x3, w3, bi3), atol=1e-4, rtol=1e-4)

    # 4) forced column-tiled (units_out-tiling) path — the large-weight fallback —
    #    exercised here at small shape via tn=128.
    out3t = jax.block_until_ready(densenet_block(x3, wt3, b3, tn=128))
    assert jnp.allclose(out3t, ref_forward(x3, w3, bi3), atol=1e-4, rtol=1e-4)

    # 5) bf16 weight / bf16 matmul operands (f32 accumulation), looser tolerance.
    wt_b, b2_b = prepare_params(weight, bias, bf16_weight=True)
    out_b = jax.block_until_ready(densenet_block(x, wt_b, b2_b, bf16_matmul=True))
    assert jnp.allclose(out_b, ref_forward(x, weight, bias), atol=5e-2, rtol=5e-2)

    # TODO(synk): batchnorm=True path (BatchNorm1d / LayerNorm) not implemented;
    # the module default is batchnorm=False so only the default forward is covered.
    print("KERNEL_OK")
</pallas_src>

<mosaic_0001>
module attributes {stable_mosaic.version = 11 : i64} {
  func.func @_resident_kernel(%arg0: i32, %arg1: memref<8x32xf32, #tpu.memory_space<vmem>>, %arg2: memref<32x64xf32, #tpu.memory_space<vmem>>, %arg3: memref<1x64xf32, #tpu.memory_space<vmem>>, %arg4: memref<8x96xf32, #tpu.memory_space<vmem>>) attributes {dimension_semantics = [#tpu.dimension_semantics<parallel>], iteration_bounds = array<i64: 1>, scalar_prefetch = 0 : i64, scratch_operands = 0 : i64, tpu.core_type = #tpu.core_type<tc>, window_params = [{transform_indices = @transform_0, window_bounds = array<i64: 8, 32>}, {pipeline_mode = #tpu.pipeline_mode<synchronous>, transform_indices = @transform_1, window_bounds = array<i64: 32, 64>}, {pipeline_mode = #tpu.pipeline_mode<synchronous>, transform_indices = @transform_2, window_bounds = array<i64: 1, 64>}, {transform_indices = @transform_3, window_bounds = array<i64: 8, 96>}]} {
    %c0 = arith.constant 0 : index
    %c0_0 = arith.constant 0 : index
    %0 = vector.load %arg1[%c0, %c0_0] : memref<8x32xf32, #tpu.memory_space<vmem>>, vector<8x32xf32>
    %c0_1 = arith.constant 0 : index
    %c0_2 = arith.constant 0 : index
    %1 = vector.load %arg2[%c0_1, %c0_2] : memref<32x64xf32, #tpu.memory_space<vmem>>, vector<32x64xf32>
    %cst = arith.constant dense<0.000000e+00> : vector<8x64xf32>
    %2 = tpu.matmul %0, %1, %cst {dimension_numbers = #tpu.dot_dimension_numbers<[1], [0], [0], [1], [0, 0, 1, 1], [], []>} : vector<8x32xf32>, vector<32x64xf32>, vector<8x64xf32> -> vector<8x64xf32>
    %c0_3 = arith.constant 0 : index
    %c0_4 = arith.constant 0 : index
    %3 = vector.load %arg3[%c0_3, %c0_4] : memref<1x64xf32, #tpu.memory_space<vmem>>, vector<1x64xf32>
    %4 = vector.broadcast %3 : vector<1x64xf32> to vector<8x64xf32>
    %5 = arith.addf %2, %4 : vector<8x64xf32>
    %cst_5 = arith.constant 0.000000e+00 : f32
    %6 = vector.broadcast %cst_5 : f32 to vector<8x64xf32>
    %7 = arith.maximumf %5, %6 : vector<8x64xf32>
    %8 = tpu.concatenate %7, %0 in 1 : vector<8x64xf32>, vector<8x32xf32> -> vector<8x96xf32>
    %c0_6 = arith.constant 0 : index
    %c0_7 = arith.constant 0 : index
    %9 = vector.load %arg4[%c0_6, %c0_7] : memref<8x96xf32, #tpu.memory_space<vmem>>, vector<8x96xf32>
    tpu.vector_store %arg4[%c0_6, %c0_7], %8 {strides = array<i32>} : memref<8x96xf32, #tpu.memory_space<vmem>>, vector<8x96xf32>,
    return
  }
  func.func @transform_0(%arg0: i32) -> (i32, i32) {
    %c0_i32 = arith.constant 0 : i32
    %c0_i32_0 = arith.constant 0 : i32
    return %arg0, %c0_i32 : i32, i32
  }
  func.func @transform_1(%arg0: i32) -> (i32, i32) {
    %c0_i32 = arith.constant 0 : i32
    %c0_i32_0 = arith.constant 0 : i32
    %c0_i32_1 = arith.constant 0 : i32
    return %c0_i32, %c0_i32_0 : i32, i32
  }
  func.func @transform_2(%arg0: i32) -> (i32, i32) {
    %c0_i32 = arith.constant 0 : i32
    %c0_i32_0 = arith.constant 0 : i32
    %c0_i32_1 = arith.constant 0 : i32
    return %c0_i32, %c0_i32_0 : i32, i32
  }
  func.func @transform_3(%arg0: i32) -> (i32, i32) {
    %c0_i32 = arith.constant 0 : i32
    %c0_i32_0 = arith.constant 0 : i32
    return %arg0, %c0_i32 : i32, i32
  }
}

module attributes {stable_mosaic.version = 11 : i64} {
  func.func @_resident_kernel(%arg0: i32, %arg1: memref<8x32xf32, #tpu.memory_space<vmem>>, %arg2: memref<32x64xf32, #tpu.memory_space<vmem>>, %arg3: memref<1x64xf32, #tpu.memory_space<vmem>>, %arg4: memref<8x96xf32, #tpu.memory_space<vmem>>) attributes {dimension_semantics = [#tpu.dimension_semantics<parallel>], iteration_bounds = array<i64: 1>, scalar_prefetch = 0 : i64, scratch_operands = 0 : i64, tpu.core_type = #tpu.core_type<tc>, window_params = [{transform_indices = @transform_0, window_bounds = array<i64: 8, 32>}, {pipeline_mode = #tpu.pipeline_mode<synchronous>, transform_indices = @transform_1, window_bounds = array<i64: 32, 64>}, {pipeline_mode = #tpu.pipeline_mode<synchronous>, transform_indices = @transform_2, window_bounds = array<i64: 1, 64>}, {transform_indices = @transform_3, window_bounds = array<i64: 8, 96>}]} {
    %c0 = arith.constant 0 : index
    %c0_0 = arith.constant 0 : index
    %0 = vector.load %arg1[%c0, %c0_0] : memref<8x32xf32, #tpu.memory_space<vmem>>, vector<8x32xf32>
    %c0_1 = arith.constant 0 : index
    %c0_2 = arith.constant 0 : index
    %1 = vector.load %arg2[%c0_1, %c0_2] : memref<32x64xf32, #tpu.memory_space<vmem>>, vector<32x64xf32>
    %cst = arith.constant dense<0.000000e+00> : vector<8x64xf32>
    %2 = tpu.matmul %0, %1, %cst {dimension_numbers = #tpu.dot_dimension_numbers<[1], [0], [0], [1], [0, 0, 1, 1], [], []>} : vector<8x32xf32>, vector<32x64xf32>, vector<8x64xf32> -> vector<8x64xf32>
    %c0_3 = arith.constant 0 : index
    %c0_4 = arith.constant 0 : index
    %3 = vector.load %arg3[%c0_3, %c0_4] : memref<1x64xf32, #tpu.memory_space<vmem>>, vector<1x64xf32>
    %4 = vector.broadcast %3 : vector<1x64xf32> to vector<8x64xf32>
    %5 = arith.addf %2, %4 : vector<8x64xf32>
    %cst_5 = arith.constant 0.000000e+00 : f32
    %6 = vector.broadcast %cst_5 : f32 to vector<8x64xf32>
    %7 = arith.maximumf %5, %6 : vector<8x64xf32>
    %8 = tpu.concatenate %7, %0 in 1 : vector<8x64xf32>, vector<8x32xf32> -> vector<8x96xf32>
    %c0_6 = arith.constant 0 : index
    %c0_7 = arith.constant 0 : index
    %9 = vector.load %arg4[%c0_6, %c0_7] : memref<8x96xf32, #tpu.memory_space<vmem>>, vector<8x96xf32>
    tpu.vector_store %arg4[%c0_6, %c0_7], %8 {strides = array<i32>} : memref<8x96xf32, #tpu.memory_space<vmem>>, vector<8x96xf32>,
    return
  }
  func.func @transform_0(%arg0: i32) -> (i32, i32) {
    %c0_i32 = arith.constant 0 : i32
    %c0_i32_0 = arith.constant 0 : i32
    return %arg0, %c0_i32 : i32, i32
  }
  func.func @transform_1(%arg0: i32) -> (i32, i32) {
    %c0_i32 = arith.constant 0 : i32
    %c0_i32_0 = arith.constant 0 : i32
    %c0_i32_1 = arith.constant 0 : i32
    return %c0_i32, %c0_i32_0 : i32, i32
  }
  func.func @transform_2(%arg0: i32) -> (i32, i32) {
    %c0_i32 = arith.constant 0 : i32
    %c0_i32_0 = arith.constant 0 : i32
    %c0_i32_1 = arith.constant 0 : i32
    return %c0_i32, %c0_i32_0 : i32, i32
  }
  func.func @transform_3(%arg0: i32) -> (i32, i32) {
    %c0_i32 = arith.constant 0 : i32
    %c0_i32_0 = arith.constant 0 : i32
    return %arg0, %c0_i32 : i32, i32
  }
}

</mosaic_0001>

<bundles_post_ra>
// kernel: tpu_custom_call.1
= control target key start
LH: loop header
LB: loop body
LE: loop exit
PB: predicated region body
PF: predicated region fallthrough
CT: control target
= control target key end

     0   :  { %8 = vsyncpa [#allocation3], 0  ;;  %s331_s0 = inlined_call_operand.hbm [shape: f32[8,32], index: 0, kind: input, shape index: {}]   ;;  %s332_s1 = inlined_call_operand.hbm [shape: f32[32,64], index: 1, kind: input, shape index: {}]   ;;  %s333_s2 = inlined_call_operand.vmem [shape: f32[1,64], index: 2, kind: input, shape index: {}]   ;;  %s334_s3 = inlined_call_operand.hbm [shape: f32[8,96], index: 3, kind: output, shape index: {}]  }
   0x1   :  { %9 = vsyncpa [#allocation6], 0 }
   0x2   :  { %10 = vsyncpa [#allocation4], 0  ;;  %s256_s12 = smov [#allocation2]   ;;  %s257_s14 = smov [#allocation5]  }
   0x3   :  { %s17_s13 = sshll.u32 %s256_s12, 4  ;;  %s26_s15 = sshll.u32 %s257_s14, 4  ;;  %s18_s13 = int_to_ptr.vmem [resolvable:$true] %s17_s13  ;;  %s285_s15 = int_to_ptr.vmem [resolvable:$true] %s26_s15 }
   0x4   :  { %s184_s18 = scalar_lea.hbm %s331_s0, 128 }
   0x5   :  { %p185_p0 = scmp.ne.s32.totalorder %s331_s0, %s184_s18  ;;  %p188_p1 = scmp.lt.u32.totalorder %s184_s18, %s331_s0 }
   0x7   :  { %p190_p2 = pnand %p188_p1, %p185_p0 }
   0x9   :  { %193 = shalt.err (!%p190_p2)
}
   0xa   :  { %s194_s23 = scalar_lea.vmem %s18_s13, 128  ;;  %p199_p4 = scmp.lt.s32.totalorder %s18_s13, %s18_s13 }
   0xb   :  { %p195_p3 = scmp.ne.s32.totalorder %s18_s13, %s194_s23  ;;  %p200_p5 = scmp.lt.s32.totalorder %s194_s23, %s194_s23 }
   0xd   :  { %p201_p6 = por %p200_p5, %p199_p4 }
   0xf   :  { %p202_p7 = pnand %p201_p6, %p195_p3 }
  0x11   :  { %205 = shalt.err (!%p202_p7)
}
  0x12   :  { %20 = dma.hbm_to_vmem [thread:$0]  %s331_s0, 128, %s18_s13, [#allocation3]  }
  0x13   :  { %s206_s28 = scalar_lea.hbm %s332_s1, 512 }
  0x14   :  { %p207_p8 = scmp.ne.s32.totalorder %s332_s1, %s206_s28  ;;  %p210_p9 = scmp.lt.u32.totalorder %s206_s28, %s332_s1 }
  0x16   :  { %p212_p10 = pnand %p210_p9, %p207_p8 }
  0x18   :  { %215 = shalt.err (!%p212_p10)
}
  0x19   :  { %s216_s6 = scalar_lea.vmem %s285_s15, 512  ;;  %p221_p12 = scmp.lt.s32.totalorder %s285_s15, %s285_s15 }
  0x1a   :  { %p217_p11 = scmp.ne.s32.totalorder %s285_s15, %s216_s6  ;;  %p222_p13 = scmp.lt.s32.totalorder %s216_s6, %s216_s6 }
  0x1c   :  { %p223_p0 = por %p222_p13, %p221_p12 }
  0x1e   :  { %p224_p1 = pnand %p223_p0, %p217_p11 }
  0x20   :  { %227 = shalt.err (!%p224_p1)
}
  0x21   :  { %s258_s0 = smov 128   ;;  %s259_s7 = smov 8  }
  0x22   :  { %32 = dma.hbm_to_vmem [thread:$0]  %s332_s1, 512, %s285_s15, [#allocation6], %s258_s0, %s258_s0, %s259_s7  }
  0x23   :  { %250 = dma.done.wait [#allocation3], 128  }
  0x24   :  { %251 = vsyncadd [#allocation3], 4294967168 }
  0x25   :  { %252 = dma.done.wait [#allocation6], 512  }
  0x26   :  { %253 = vsyncadd [#allocation6], 4294966784  ;;  %v260_v0 = vmov 0.0|0.0   ;;  %vm261_vm0 = vmmov 0   ;;  %v262_v1 = vmov 0.0   ;;  %v42_v2 = vld [vmem:[#allocation5] sm:$0xff] }
  0x27   :  { %169 = vmatprep.subr.bf16.mxu0 %v260_v0  ;;  %166 = vmatprep.mubr.msk.f32.mxu0 %vm261_vm0, %v262_v1  ;;  %v43_v3 = vld [vmem:[#allocation5 + $0x8] sm:$0xff]  ;;  %v44_v4 = vld [vmem:[#allocation5 + $0x10] sm:$0xff]  ;;  %v45_v6 = vld [vmem:[#allocation5 + $0x18] sm:$0xff]  ;;  %s263_s10 = smov 64   ;;  %vm53_vm1 = vcmask 261120   ;;  %s264_s12 = smov [#allocation7]  }
  0x28   :  { %v170_v5 = vpack.c.bf16 %v43_v3, %v42_v2  ;;  %v41_v7 = vld [vmem:[#allocation2] sm:$0xff]  ;;  %v173_v8 = vpack.c.bf16 %v45_v6, %v44_v4  ;;  %s141_s13 = sshll.u32 %s264_s12, 4  ;;  %vm131_vm2 = vcmask 523264   ;;  %vm133_vm3 = vcmask 785408   ;;  %s142_s13 = int_to_ptr.vmem [resolvable:$true] %s141_s13 }
  0x29   :  { %128 = vrot.lane.b32.xlu0 %v41_v7, %s263_s10  ;;  %v151_v9 = vld [vmem:[%s333_s2] ss:$0 sm:$0xff]  ;;  %s228_s14 = scalar_lea.vmem %s142_s13, 128  ;;  %p233_p3 = scmp.lt.s32.totalorder %s142_s13, %s142_s13 }
  0x2a   :  { %171 = vmatpush3.bf16.msra.mxu0 %v170_v5  ;;  %p229_p2 = scmp.ne.s32.totalorder %s142_s13, %s228_s14  ;;  %p234_p4 = scmp.lt.s32.totalorder %s228_s14, %s228_s14 }
  0x2b   :  { %172 = vmatprep.subr.bf16.mxu0 %v260_v0 }
  0x2c   :  { %p235_p5 = por %p234_p4, %p233_p3 }
  0x2e   :  { %174 = vmatpush3.bf16.msra.mxu0 %v173_v8  ;;  %p236_p6 = pnand %p235_p5, %p229_p2 }
  0x31   :  { %167 = vmatmul.mubr.msk.f32.vlgmr.msra.gmra.mrb[0].mxu0 %vm53_vm1, %v41_v7 }
  0x9b   :  { %v129_v13 = vpop.permute.xlu0 %128 }
 0x104   :  { %v123_v10 = vpop.f32.mrb[0].mxu0 }
 0x105   :  { %v124_v11 = vadd.f32 %v151_v9, %v123_v10  ;;  %v168_v12 = vpop.f32.mrb[1].mxu0 }
 0x107   :  { %v127_v14 = vmax.f32 %v124_v11, 0.0 }
 0x109   :  { %v132_v15 = vsel %vm131_vm2, %v127_v14, %v129_v13 }
 0x10a   :  { %134 = vst.msk [vmem:[#allocation7] sm:$0xff] %vm133_vm3, %v132_v15 }
 0x10b   :  { %239 = shalt.err (!%p236_p6)
}
 0x10c   :  { %s240_s16 = scalar_lea.hbm %s334_s3, 128 }
 0x10d   :  { %p241_p7 = scmp.ne.s32.totalorder %s334_s3, %s240_s16  ;;  %p244_p8 = scmp.lt.u32.totalorder %s240_s16, %s334_s3 }
 0x10f   :  { %p246_p9 = pnand %p244_p8, %p241_p7 }
 0x111   :  { %249 = shalt.err (!%p246_p9)
}
 0x112   :  { %144 = dma.vmem_to_hbm [thread:$0]  %s142_s13, 128, %s334_s3, [#allocation4]  }
 0x113   :  { %254 = dma.done.wait [#allocation4], 128  }
 0x114   :  { %255 = vsyncadd [#allocation4], 4294967168 }
 0x115   :  { %148 = vsyncpa [#allocation3], 1 }
 0x116   :  { %149 = vsyncpa [#allocation6], 1 }
 0x117   :  { %150 = vsyncpa [#allocation4], 1 }

// kernel: tpu_custom_call.1
= control target key start
LH: loop header
LB: loop body
LE: loop exit
PB: predicated region body
PF: predicated region fallthrough
CT: control target
= control target key end

     0   :  { %8 = vsyncpa [#allocation3], 0  ;;  %s331_s0 = inlined_call_operand.hbm [shape: f32[8,32], index: 0, kind: input, shape index: {}]   ;;  %s332_s1 = inlined_call_operand.hbm [shape: f32[32,64], index: 1, kind: input, shape index: {}]   ;;  %s333_s2 = inlined_call_operand.vmem [shape: f32[1,64], index: 2, kind: input, shape index: {}]   ;;  %s334_s3 = inlined_call_operand.hbm [shape: f32[8,96], index: 3, kind: output, shape index: {}]  }
   0x1   :  { %9 = vsyncpa [#allocation6], 0 }
   0x2   :  { %10 = vsyncpa [#allocation4], 0  ;;  %s256_s12 = smov [#allocation2]   ;;  %s257_s14 = smov [#allocation5]  }
   0x3   :  { %s17_s13 = sshll.u32 %s256_s12, 4  ;;  %s26_s15 = sshll.u32 %s257_s14, 4  ;;  %s18_s13 = int_to_ptr.vmem [resolvable:$true] %s17_s13  ;;  %s285_s15 = int_to_ptr.vmem [resolvable:$true] %s26_s15 }
   0x4   :  { %s184_s18 = scalar_lea.hbm %s331_s0, 128 }
   0x5   :  { %p185_p0 = scmp.ne.s32.totalorder %s331_s0, %s184_s18  ;;  %p188_p1 = scmp.lt.u32.totalorder %s184_s18, %s331_s0 }
   0x7   :  { %p190_p2 = pnand %p188_p1, %p185_p0 }
   0x9   :  { %193 = shalt.err (!%p190_p2)
}
   0xa   :  { %s194_s23 = scalar_lea.vmem %s18_s13, 128  ;;  %p199_p4 = scmp.lt.s32.totalorder %s18_s13, %s18_s13 }
   0xb   :  { %p195_p3 = scmp.ne.s32.totalorder %s18_s13, %s194_s23  ;;  %p200_p5 = scmp.lt.s32.totalorder %s194_s23, %s194_s23 }
   0xd   :  { %p201_p6 = por %p200_p5, %p199_p4 }
   0xf   :  { %p202_p7 = pnand %p201_p6, %p195_p3 }
  0x11   :  { %205 = shalt.err (!%p202_p7)
}
  0x12   :  { %20 = dma.hbm_to_vmem [thread:$0]  %s331_s0, 128, %s18_s13, [#allocation3]  }
  0x13   :  { %s206_s28 = scalar_lea.hbm %s332_s1, 512 }
  0x14   :  { %p207_p8 = scmp.ne.s32.totalorder %s332_s1, %s206_s28  ;;  %p210_p9 = scmp.lt.u32.totalorder %s206_s28, %s332_s1 }
  0x16   :  { %p212_p10 = pnand %p210_p9, %p207_p8 }
  0x18   :  { %215 = shalt.err (!%p212_p10)
}
  0x19   :  { %s216_s6 = scalar_lea.vmem %s285_s15, 512  ;;  %p221_p12 = scmp.lt.s32.totalorder %s285_s15, %s285_s15 }
  0x1a   :  { %p217_p11 = scmp.ne.s32.totalorder %s285_s15, %s216_s6  ;;  %p222_p13 = scmp.lt.s32.totalorder %s216_s6, %s216_s6 }
  0x1c   :  { %p223_p0 = por %p222_p13, %p221_p12 }
  0x1e   :  { %p224_p1 = pnand %p223_p0, %p217_p11 }
  0x20   :  { %227 = shalt.err (!%p224_p1)
}
  0x21   :  { %s258_s0 = smov 128   ;;  %s259_s7 = smov 8  }
  0x22   :  { %32 = dma.hbm_to_vmem [thread:$0]  %s332_s1, 512, %s285_s15, [#allocation6], %s258_s0, %s258_s0, %s259_s7  }
  0x23   :  { %250 = dma.done.wait [#allocation3], 128  }
  0x24   :  { %251 = vsyncadd [#allocation3], 4294967168 }
  0x25   :  { %252 = dma.done.wait [#allocation6], 512  }
  0x26   :  { %253 = vsyncadd [#allocation6], 4294966784  ;;  %v260_v0 = vmov 0.0|0.0   ;;  %vm261_vm0 = vmmov 0   ;;  %v262_v1 = vmov 0.0   ;;  %v42_v2 = vld [vmem:[#allocation5] sm:$0xff] }
  0x27   :  { %169 = vmatprep.subr.bf16.mxu0 %v260_v0  ;;  %166 = vmatprep.mubr.msk.f32.mxu0 %vm261_vm0, %v262_v1  ;;  %v43_v3 = vld [vmem:[#allocation5 + $0x8] sm:$0xff]  ;;  %v44_v4 = vld [vmem:[#allocation5 + $0x10] sm:$0xff]  ;;  %v45_v6 = vld [vmem:[#allocation5 + $0x18] sm:$0xff]  ;;  %s263_s10 = smov 64   ;;  %vm53_vm1 = vcmask 261120   ;;  %s264_s12 = smov [#allocation7]  }
  0x28   :  { %v170_v5 = vpack.c.bf16 %v43_v3, %v42_v2  ;;  %v41_v7 = vld [vmem:[#allocation2] sm:$0xff]  ;;  %v173_v8 = vpack.c.bf16 %v45_v6, %v44_v4  ;;  %s141_s13 = sshll.u32 %s264_s12, 4  ;;  %vm131_vm2 = vcmask 523264   ;;  %vm133_vm3 = vcmask 785408   ;;  %s142_s13 = int_to_ptr.vmem [resolvable:$true] %s141_s13 }
  0x29   :  { %128 = vrot.lane.b32.xlu0 %v41_v7, %s263_s10  ;;  %v151_v9 = vld [vmem:[%s333_s2] ss:$0 sm:$0xff]  ;;  %s228_s14 = scalar_lea.vmem %s142_s13, 128  ;;  %p233_p3 = scmp.lt.s32.totalorder %s142_s13, %s142_s13 }
  0x2a   :  { %171 = vmatpush3.bf16.msra.mxu0 %v170_v5  ;;  %p229_p2 = scmp.ne.s32.totalorder %s142_s13, %s228_s14  ;;  %p234_p4 = scmp.lt.s32.totalorder %s228_s14, %s228_s14 }
  0x2b   :  { %172 = vmatprep.subr.bf16.mxu0 %v260_v0 }
  0x2c   :  { %p235_p5 = por %p234_p4, %p233_p3 }
  0x2e   :  { %174 = vmatpush3.bf16.msra.mxu0 %v173_v8  ;;  %p236_p6 = pnand %p235_p5, %p229_p2 }
  0x31   :  { %167 = vmatmul.mubr.msk.f32.vlgmr.msra.gmra.mrb[0].mxu0 %vm53_vm1, %v41_v7 }
  0x9b   :  { %v129_v13 = vpop.permute.xlu0 %128 }
 0x104   :  { %v123_v10 = vpop.f32.mrb[0].mxu0 }
 0x105   :  { %v124_v11 = vadd.f32 %v151_v9, %v123_v10  ;;  %v168_v12 = vpop.f32.mrb[1].mxu0 }
 0x107   :  { %v127_v14 = vmax.f32 %v124_v11, 0.0 }
 0x109   :  { %v132_v15 = vsel %vm131_vm2, %v127_v14, %v129_v13 }
 0x10a   :  { %134 = vst.msk [vmem:[#allocation7] sm:$0xff] %vm133_vm3, %v132_v15 }
 0x10b   :  { %239 = shalt.err (!%p236_p6)
}
 0x10c   :  { %s240_s16 = scalar_lea.hbm %s334_s3, 128 }
 0x10d   :  { %p241_p7 = scmp.ne.s32.totalorder %s334_s3, %s240_s16  ;;  %p244_p8 = scmp.lt.u32.totalorder %s240_s16, %s334_s3 }
 0x10f   :  { %p246_p9 = pnand %p244_p8, %p241_p7 }
 0x111   :  { %249 = shalt.err (!%p246_p9)
}
 0x112   :  { %144 = dma.vmem_to_hbm [thread:$0]  %s142_s13, 128, %s334_s3, [#allocation4]  }
 0x113   :  { %254 = dma.done.wait [#allocation4], 128  }
 0x114   :  { %255 = vsyncadd [#allocation4], 4294967168 }
 0x115   :  { %148 = vsyncpa [#allocation3], 1 }
 0x116   :  { %149 = vsyncpa [#allocation6], 1 }
 0x117   :  { %150 = vsyncpa [#allocation4], 1 }

</bundles_post_ra>
